<compile_context>
chip_gen: v7x
topology: tpu7x:2x2x1
jax: 0.10.0
libtpu: 0.0.40
codegen_flags: <defaults>
</compile_context>

<pallas_src>
import functools

import jax
import jax.numpy as jnp
from jax.experimental import pallas as pl
from jax.experimental.pallas import tpu as pltpu


def _channel_attention_kernel(x_ref, w1t_ref, b1_ref, w2t_ref, b2_ref,
                              o_ref, acc_ref, *, inv_hw, hw, mask_last):
    # x_ref:   (TB, C, THW)  one spatial tile of TB batch rows (native dtype)
    # w1t_ref: (C, C_out)    encodeConv weight, pre-transposed (f32)
    # b1_ref:  (1, C_out)
    # w2t_ref: (C_out, C)    decodeConv weight, pre-transposed (f32)
    # b2_ref:  (1, C)
    # o_ref:   (TB, C)       output block (resident across the reduction axis)
    # acc_ref: (TB, C) f32   pooled-sum accumulator (VMEM scratch)
    k = pl.program_id(1)

    @pl.when(k == 0)
    def _():
        acc_ref[...] = jnp.zeros_like(acc_ref)

    xs = x_ref[...]                                   # (TB, C, THW)
    if mask_last:
        # Ragged spatial tail: lanes at/after the true H*W hold undefined data
        # and MUST be zeroed before the partial sum.
        thw = xs.shape[-1]
        lane = jax.lax.broadcasted_iota(jnp.int32, (1, thw), 1)   # (1, THW)
        valid = (k * thw + lane) < hw                              # (1, THW)
        xs = jnp.where(valid, xs, jnp.zeros_like(xs))

    # Partial global-average-pool: accumulate this spatial tile in f32
    # (widening happens inside the reduce; no separate f32 copy of the tile).
    acc_ref[...] += jnp.sum(xs, axis=-1, dtype=jnp.float32)        # (TB, C)

    @pl.when(k == pl.num_programs(1) - 1)
    def _():
        pooled = acc_ref[...] * inv_hw                 # scale by true 1/(H*W)

        # encodeConv (1x1 conv == matmul) + ReLU
        h = jnp.dot(pooled, w1t_ref[...], preferred_element_type=jnp.float32)
        h = jnp.maximum(h + b1_ref[...], 0.0)          # (TB, C_out)

        # decodeConv (1x1 conv == matmul) + sigmoid
        y = jnp.dot(h, w2t_ref[...], preferred_element_type=jnp.float32)
        y = y + b2_ref[...]                            # (TB, C)
        o_ref[...] = jax.nn.sigmoid(y).astype(o_ref.dtype)


def _vmem_budget():
    """Generation-aware (per-x-buffer budget, vmem_limit_bytes)."""
    cap = 64 * 1024 * 1024            # conservative fallback (v7x per-core VMEM)
    try:
        info = pltpu.get_tpu_info()
        cap = int(getattr(info, "vmem_capacity_bytes", cap) or cap)
    except Exception:
        pass
    # Double-buffered input must leave headroom for output/scratch/weights.
    budget = min(16 * 1024 * 1024, cap // 6)   # ~16 MiB on 128 MiB parts, ~10.6 MiB on v7x
    limit = min(64 * 1024 * 1024, cap * 3 // 4)  # 64 MiB on v5e/v6e, 48 MiB on v7x
    return max(budget, 2 * 1024 * 1024), limit


def _choose_tiles(N, C, HW, itemsize, budget):
    """Pick (TB, THW) — (8,128)-legal blocks under the per-buffer budget."""
    hw128 = ((HW + 127) // 128) * 128

    if N <= 8:
        TB = N                        # full batch dim: always layout-legal
    else:
        # Largest multiple-of-8 tile that still leaves >= 2 batch tiles, so the
        # "parallel" grid axis can be sharded across megacore TensorCores.
        TB = max(t for t in (64, 32, 16, 8) if t < N)
    # Keep even the minimal (TB, C, 128) block inside the per-buffer budget.
    while TB > 8 and TB * C * 128 * itemsize > budget:
        TB //= 2

    # Spatial (lane) tile: largest multiple of 128 that fits the budget.
    max_thw = max(128, (budget // max(1, TB * C * itemsize)) // 128 * 128)
    THW = min(hw128, max_thw)
    if THW >= HW:
        THW = HW                      # full spatial extent: no ragged tile at all
    return TB, THW


def channel_attention(x, w1, b1, w2, b2, *, block_bytes=None):
    """x: (N, C, H, W); w1: (C_out, C_in); b1: (C_out,);
    w2: (C_in, C_out); b2: (C_in,). Returns (N, C_in, 1, 1) in x.dtype.
    `block_bytes` optionally overrides the auto VMEM tile budget (testing)."""
    N, C, H, W = x.shape
    C_out = w1.shape[0]
    HW = H * W
    itemsize = jnp.dtype(x.dtype).itemsize

    budget, vmem_limit = _vmem_budget()
    if block_bytes is not None:
        budget = block_bytes
    TB, THW = _choose_tiles(N, C, HW, itemsize, budget)

    # Free view: NCHW is contiguous, so this reshape moves no data.  x stays in
    # its native dtype (bf16 stays bf16 -> half the HBM traffic).
    x_flat = x.reshape(N, C, HW)

    w1t = jnp.transpose(w1).astype(jnp.float32)          # (C_in, C_out)
    b1r = b1.reshape(1, C_out).astype(jnp.float32)
    w2t = jnp.transpose(w2).astype(jnp.float32)          # (C_out, C_in)
    b2r = b2.reshape(1, C).astype(jnp.float32)

    grid = (pl.cdiv(N, TB), pl.cdiv(HW, THW))
    mask_last = (HW % THW) != 0

    kernel = functools.partial(_channel_attention_kernel,
                               inv_hw=1.0 / HW, hw=HW, mask_last=mask_last)

    # Advisory cost: this op is a long HBM stream with negligible compute.
    cost = pl.CostEstimate(
        flops=2 * N * C * HW + 4 * N * C * C_out,
        transcendentals=N * C,
        bytes_accessed=N * C * HW * itemsize
        + (2 * C * C_out + C + C_out) * 4
        + N * C * itemsize,
    )

    out = pl.pallas_call(
        kernel,
        out_shape=jax.ShapeDtypeStruct((N, C), x.dtype),
        grid_spec=pltpu.PrefetchScalarGridSpec(
            num_scalar_prefetch=0,
            grid=grid,
            in_specs=[
                pl.BlockSpec((TB, C, THW), lambda b, k: (b, 0, k)),
                pl.BlockSpec((C, C_out), lambda b, k: (0, 0)),
                pl.BlockSpec((1, C_out), lambda b, k: (0, 0)),
                pl.BlockSpec((C_out, C), lambda b, k: (0, 0)),
                pl.BlockSpec((1, C), lambda b, k: (0, 0)),
            ],
            out_specs=pl.BlockSpec((TB, C), lambda b, k: (b, 0)),
            scratch_shapes=[pltpu.VMEM((TB, C), jnp.float32)],
        ),
        compiler_params=pltpu.CompilerParams(
            dimension_semantics=("parallel", "arbitrary"),
            vmem_limit_bytes=vmem_limit,
        ),
        cost_estimate=cost,
    )(x_flat, w1t, b1r, w2t, b2r)

    return out.reshape(N, C, 1, 1)


def reference(x, w1, b1, w2, b2):
    pooled = jnp.mean(x.astype(jnp.float32), axis=(2, 3))  # (N, C)
    h = jnp.maximum(pooled @ w1.T + b1, 0.0)                # (N, C_out)
    y = h @ w2.T + b2                                       # (N, C)
    return jax.nn.sigmoid(y).reshape(x.shape[0], x.shape[1], 1, 1)


def _make_params(key, C_in, C_out):
    k1, kb1, k2, kb2 = jax.random.split(key, 4)
    bound1 = 1.0 / jnp.sqrt(C_in)
    w1 = jax.random.uniform(k1, (C_out, C_in), minval=-bound1, maxval=bound1)
    b1 = jax.random.uniform(kb1, (C_out,), minval=-bound1, maxval=bound1)
    bound2 = 1.0 / jnp.sqrt(C_out)
    w2 = jax.random.uniform(k2, (C_in, C_out), minval=-bound2, maxval=bound2)
    b2 = jax.random.uniform(kb2, (C_in,), minval=-bound2, maxval=bound2)
    return w1, b1, w2, b2


if __name__ == "__main__":
    key = jax.random.PRNGKey(0)
    kx1, kp1, kx2, kp2 = jax.random.split(key, 4)

    # --- Test 1: the module's nominal small shape (single block, no masking).
    N, C_in, H, W = 2, 4, 16, 16
    C_out = 2
    x = jax.random.normal(kx1, (N, C_in, H, W), dtype=jnp.float32)
    w1, b1, w2, b2 = _make_params(kp1, C_in, C_out)

    out = channel_attention(x, w1, b1, w2, b2)
    jax.block_until_ready(out)
    ref = reference(x, w1, b1, w2, b2)
    assert out.shape == (N, C_in, 1, 1)
    assert jnp.allclose(out, ref, atol=1e-5, rtol=1e-5), "mismatch vs reference (test 1)"

    # --- Test 2: ragged batch tile + ragged (masked) spatial tile, forced by a
    # tiny tile budget so the multi-step reduction / masking path is exercised.
    N2, C2, H2, W2 = 10, 8, 12, 12          # HW=144 -> tiles of 128 + masked 16
    C2_out = 4
    x2 = jax.random.normal(kx2, (N2, C2, H2, W2), dtype=jnp.float32)
    w1b, b1b, w2b, b2b = _make_params(kp2, C2, C2_out)

    out2 = channel_attention(x2, w1b, b1b, w2b, b2b,
                             block_bytes=8 * C2 * 128 * 4)
    jax.block_until_ready(out2)
    ref2 = reference(x2, w1b, b1b, w2b, b2b)
    assert out2.shape == (N2, C2, 1, 1)
    assert jnp.allclose(out2, ref2, atol=1e-5, rtol=1e-5), "mismatch vs reference (test 2)"

    print("KERNEL_OK")
</pallas_src>

<mosaic_0001>
module attributes {stable_mosaic.version = 11 : i64} {
  func.func @_channel_attention_kernel(%arg0: i32, %arg1: i32, %arg2: memref<2x4x256xf32, #tpu.memory_space<vmem>>, %arg3: memref<4x2xf32, #tpu.memory_space<vmem>>, %arg4: memref<1x2xf32, #tpu.memory_space<vmem>>, %arg5: memref<2x4xf32, #tpu.memory_space<vmem>>, %arg6: memref<1x4xf32, #tpu.memory_space<vmem>>, %arg7: memref<2x4xf32, #tpu.memory_space<vmem>>, %arg8: memref<2x4xf32, #tpu.memory_space<vmem>>) attributes {dimension_semantics = [#tpu.dimension_semantics<parallel>, #tpu.dimension_semantics<arbitrary>], iteration_bounds = array<i64: 1, 1>, scalar_prefetch = 0 : i64, scratch_operands = 1 : i64, tpu.core_type = #tpu.core_type<tc>, window_params = [{transform_indices = @transform_0, window_bounds = array<i64: 2, 4, 256>}, {pipeline_mode = #tpu.pipeline_mode<synchronous>, transform_indices = @transform_1, window_bounds = array<i64: 4, 2>}, {pipeline_mode = #tpu.pipeline_mode<synchronous>, transform_indices = @transform_2, window_bounds = array<i64: 1, 2>}, {pipeline_mode = #tpu.pipeline_mode<synchronous>, transform_indices = @transform_3, window_bounds = array<i64: 2, 4>}, {pipeline_mode = #tpu.pipeline_mode<synchronous>, transform_indices = @transform_4, window_bounds = array<i64: 1, 4>}, {transform_indices = @transform_5, window_bounds = array<i64: 2, 4>}]} {
    %c0_i32 = arith.constant 0 : i32
    %0 = arith.cmpi eq, %arg1, %c0_i32 : i32
    %1 = arith.extui %0 : i1 to i32
    %c0_i32_0 = arith.constant 0 : i32
    %2 = arith.cmpi ne, %1, %c0_i32_0 : i32
    scf.if %2 {
      %cst_9 = arith.constant 0.000000e+00 : f32
      %11 = vector.broadcast %cst_9 : f32 to vector<2x4xf32>
      %c0_10 = arith.constant 0 : index
      %c0_11 = arith.constant 0 : index
      %12 = vector.load %arg8[%c0_10, %c0_11] : memref<2x4xf32, #tpu.memory_space<vmem>>, vector<2x4xf32>
      tpu.vector_store %arg8[%c0_10, %c0_11], %11 {strides = array<i32>} : memref<2x4xf32, #tpu.memory_space<vmem>>, vector<2x4xf32>,
    } else {
    }
    %c0 = arith.constant 0 : index
    %c0_1 = arith.constant 0 : index
    %c0_2 = arith.constant 0 : index
    %3 = vector.load %arg2[%c0, %c0_1, %c0_2] : memref<2x4x256xf32, #tpu.memory_space<vmem>>, vector<2x4x256xf32>
    %c0_3 = arith.constant 0 : index
    %c0_4 = arith.constant 0 : index
    %4 = vector.load %arg8[%c0_3, %c0_4] : memref<2x4xf32, #tpu.memory_space<vmem>>, vector<2x4xf32>
    %cst = arith.constant dense<0.000000e+00> : vector<2x4xf32>
    %5 = vector.multi_reduction <add>, %3, %cst [2] : vector<2x4x256xf32> to vector<2x4xf32>
    %6 = arith.addf %4, %5 : vector<2x4xf32>
    %c0_5 = arith.constant 0 : index
    %c0_6 = arith.constant 0 : index
    %7 = vector.load %arg8[%c0_5, %c0_6] : memref<2x4xf32, #tpu.memory_space<vmem>>, vector<2x4xf32>
    tpu.vector_store %arg8[%c0_5, %c0_6], %6 {strides = array<i32>} : memref<2x4xf32, #tpu.memory_space<vmem>>, vector<2x4xf32>,
    %c0_i32_7 = arith.constant 0 : i32
    %8 = arith.cmpi eq, %arg1, %c0_i32_7 : i32
    %9 = arith.extui %8 : i1 to i32
    %c0_i32_8 = arith.constant 0 : i32
    %10 = arith.cmpi ne, %9, %c0_i32_8 : i32
    scf.if %10 {
      %c0_9 = arith.constant 0 : index
      %c0_10 = arith.constant 0 : index
      %11 = vector.load %arg8[%c0_9, %c0_10] : memref<2x4xf32, #tpu.memory_space<vmem>>, vector<2x4xf32>
      %cst_11 = arith.constant 3.906250e-03 : f32
      %12 = vector.broadcast %cst_11 : f32 to vector<2x4xf32>
      %13 = arith.mulf %11, %12 : vector<2x4xf32>
      %c0_12 = arith.constant 0 : index
      %c0_13 = arith.constant 0 : index
      %14 = vector.load %arg3[%c0_12, %c0_13] : memref<4x2xf32, #tpu.memory_space<vmem>>, vector<4x2xf32>
      %cst_14 = arith.constant dense<0.000000e+00> : vector<2x2xf32>
      %15 = tpu.matmul %13, %14, %cst_14 {dimension_numbers = #tpu.dot_dimension_numbers<[1], [0], [0], [1], [0, 0, 1, 1], [], []>} : vector<2x4xf32>, vector<4x2xf32>, vector<2x2xf32> -> vector<2x2xf32>
      %c0_15 = arith.constant 0 : index
      %c0_16 = arith.constant 0 : index
      %16 = vector.load %arg4[%c0_15, %c0_16] : memref<1x2xf32, #tpu.memory_space<vmem>>, vector<1x2xf32>
      %17 = vector.broadcast %16 : vector<1x2xf32> to vector<2x2xf32>
      %18 = arith.addf %15, %17 : vector<2x2xf32>
      %cst_17 = arith.constant 0.000000e+00 : f32
      %19 = vector.broadcast %cst_17 : f32 to vector<2x2xf32>
      %20 = arith.maximumf %18, %19 : vector<2x2xf32>
      %c0_18 = arith.constant 0 : index
      %c0_19 = arith.constant 0 : index
      %21 = vector.load %arg5[%c0_18, %c0_19] : memref<2x4xf32, #tpu.memory_space<vmem>>, vector<2x4xf32>
      %cst_20 = arith.constant dense<0.000000e+00> : vector<2x4xf32>
      %22 = tpu.matmul %20, %21, %cst_20 {dimension_numbers = #tpu.dot_dimension_numbers<[1], [0], [0], [1], [0, 0, 1, 1], [], []>} : vector<2x2xf32>, vector<2x4xf32>, vector<2x4xf32> -> vector<2x4xf32>
      %c0_21 = arith.constant 0 : index
      %c0_22 = arith.constant 0 : index
      %23 = vector.load %arg6[%c0_21, %c0_22] : memref<1x4xf32, #tpu.memory_space<vmem>>, vector<1x4xf32>
      %24 = vector.broadcast %23 : vector<1x4xf32> to vector<2x4xf32>
      %25 = arith.addf %22, %24 : vector<2x4xf32>
      %26 = arith.negf %25 : vector<2x4xf32>
      %27 = math.exp %26 : vector<2x4xf32>
      %cst_23 = arith.constant 1.000000e+00 : f32
      %28 = vector.broadcast %cst_23 : f32 to vector<2x4xf32>
      %29 = arith.addf %28, %27 : vector<2x4xf32>
      %30 = arith.divf %28, %29 : vector<2x4xf32>
      %c0_24 = arith.constant 0 : index
      %c0_25 = arith.constant 0 : index
      %31 = vector.load %arg7[%c0_24, %c0_25] : memref<2x4xf32, #tpu.memory_space<vmem>>, vector<2x4xf32>
      tpu.vector_store %arg7[%c0_24, %c0_25], %30 {strides = array<i32>} : memref<2x4xf32, #tpu.memory_space<vmem>>, vector<2x4xf32>,
    } else {
    }
    return
  }
  func.func @transform_0(%arg0: i32, %arg1: i32) -> (i32, i32, i32) {
    %c0_i32 = arith.constant 0 : i32
    %c0_i32_0 = arith.constant 0 : i32
    return %arg0, %c0_i32, %arg1 : i32, i32, i32
  }
  func.func @transform_1(%arg0: i32, %arg1: i32) -> (i32, i32) {
    %c0_i32 = arith.constant 0 : i32
    %c0_i32_0 = arith.constant 0 : i32
    %c0_i32_1 = arith.constant 0 : i32
    return %c0_i32, %c0_i32_0 : i32, i32
  }
  func.func @transform_2(%arg0: i32, %arg1: i32) -> (i32, i32) {
    %c0_i32 = arith.constant 0 : i32
    %c0_i32_0 = arith.constant 0 : i32
    %c0_i32_1 = arith.constant 0 : i32
    return %c0_i32, %c0_i32_0 : i32, i32
  }
  func.func @transform_3(%arg0: i32, %arg1: i32) -> (i32, i32) {
    %c0_i32 = arith.constant 0 : i32
    %c0_i32_0 = arith.constant 0 : i32
    %c0_i32_1 = arith.constant 0 : i32
    return %c0_i32, %c0_i32_0 : i32, i32
  }
  func.func @transform_4(%arg0: i32, %arg1: i32) -> (i32, i32) {
    %c0_i32 = arith.constant 0 : i32
    %c0_i32_0 = arith.constant 0 : i32
    %c0_i32_1 = arith.constant 0 : i32
    return %c0_i32, %c0_i32_0 : i32, i32
  }
  func.func @transform_5(%arg0: i32, %arg1: i32) -> (i32, i32) {
    %c0_i32 = arith.constant 0 : i32
    %c0_i32_0 = arith.constant 0 : i32
    return %arg0, %c0_i32 : i32, i32
  }
}

</mosaic_0001>

<bundles_post_ra>
// kernel: tpu_custom_call.1
= control target key start
LH: loop header
LB: loop body
LE: loop exit
PB: predicated region body
PF: predicated region fallthrough
CT: control target
= control target key end

     0   :  { %10 = vsyncpa [#allocation4], 0  ;;  %s439_s0 = inlined_call_operand.hbm [shape: f32[2,4,256], index: 0, kind: input, shape index: {}]   ;;  %s440_s1 = inlined_call_operand.vmem [shape: f32[4,2], index: 1, kind: input, shape index: {}]   ;;  %s441_s2 = inlined_call_operand.vmem [shape: f32[1,2], index: 2, kind: input, shape index: {}]   ;;  %s442_s3 = inlined_call_operand.vmem [shape: f32[2,4], index: 3, kind: input, shape index: {}]   ;;  %s443_s4 = inlined_call_operand.vmem [shape: f32[1,4], index: 4, kind: input, shape index: {}]   ;;  %s444_s5 = inlined_call_operand.hbm [shape: f32[2,4], index: 5, kind: output, shape index: {}]  }
   0x1   :  { %11 = vsyncpa [#allocation5], 0  ;;  %s359_s18 = smov [#allocation3]   ;;  %s311_s22 = scalar_lea.hbm %s439_s0, 256 }
   0x2   :  { %s17_s19 = sshll.u32 %s359_s18, 4  ;;  %p312_p0 = scmp.ne.s32.totalorder %s439_s0, %s311_s22  ;;  %s18_s19 = int_to_ptr.vmem [resolvable:$true] %s17_s19 }
   0x3   :  { %p315_p1 = scmp.lt.u32.totalorder %s311_s22, %s439_s0 }
   0x5   :  { %p317_p2 = pnand %p315_p1, %p312_p0 }
   0x7   :  { %320 = shalt.err (!%p317_p2)
}
   0x8   :  { %s321_s27 = scalar_lea.vmem %s18_s19, 256  ;;  %p326_p4 = scmp.lt.s32.totalorder %s18_s19, %s18_s19 }
   0x9   :  { %p322_p3 = scmp.ne.s32.totalorder %s18_s19, %s321_s27  ;;  %p327_p5 = scmp.lt.s32.totalorder %s321_s27, %s321_s27 }
   0xb   :  { %p328_p6 = por %p327_p5, %p326_p4 }
   0xd   :  { %p329_p7 = pnand %p328_p6, %p322_p3 }
   0xf   :  { %332 = shalt.err (!%p329_p7)
}
  0x10   :  { %s360_s28 = smov 128   ;;  %s361_s29 = smov 8  }
  0x11   :  { %23 = dma.hbm_to_vmem [thread:$0]  %s439_s0, 256, %s18_s19, [#allocation4], %s360_s28, %s360_s28, %s361_s29  }
  0x12   :  { %355 = dma.done.wait [#allocation4], 256  }
  0x13   :  { %356 = vsyncadd [#allocation4], 4294967040  ;;  %vm50_vm0 = vcmask 1043456   ;;  %v41_v0 = vld [vmem:[#allocation3] sm:$0xff]  ;;  %v42_v1 = vld [vmem:[#allocation3 + $0x8] sm:$0xff]  ;;  %vm39_vm1 = vcmask 25600   ;;  %v63_v12 = vlaneseq }
  0x14   :  { %v46_v2 = vcombine.high %v41_v0, %v41_v0  ;;  %v51_v3 = vsel %vm50_vm0, %v41_v0, 0.0  ;;  %v47_v4 = vcombine.high %v42_v1, %v42_v1  ;;  %v56_v6 = vsel %vm50_vm0, %v42_v1, 0.0  ;;  %v84_v11 = vld [vmem:[%s440_s1] sm:$0xf] }
  0x15   :  { %v362_v10 = vmov 0.0   ;;  %vm363_vm2 = vmmov 0   ;;  %v64_v13 = vand.u32 127, %v63_v12  ;;  %v66_v14 = vshrl.u32 %v63_v12, 7  ;;  %v170_v25 = vld [vmem:[%s442_s3] sm:$0x3] }
  0x16   :  { %v52_v5 = vsel %vm50_vm0, %v46_v2, 0.0  ;;  %v57_v7 = vsel %vm50_vm0, %v47_v4, 0.0  ;;  %40 = vst.msk [vmem:[#allocation2] sm:$0x3] %vm39_vm1, %v362_v10  ;;  %289 = vmatprep.subr.mxu0 %v362_v10  ;;  %294 = vmatprep.subr.mxu1 %v362_v10  ;;  %vm73_vm3 = vcmask 1041409   ;;  %vm92_vm4 = vcmask 31744  }
  0x17   :  { %v53_v8 = vadd.f32 %v52_v5, %v51_v3  ;;  %v58_v9 = vadd.f32 %v57_v7, %v56_v6  ;;  %290 = vmatpush3.msk.msra.mxu0 %vm50_vm0, %v84_v11  ;;  %291 = vmatprep.mubr.msk.f32.mxu0 %vm363_vm2, %v362_v10  ;;  %v67_v16 = vsub.s32 %v64_v13, %v66_v14  ;;  %vm182_vm5 = vcmask 1041408   ;;  %v278_v26 = vld [vmem:[%s441_s2] ss:$0 sm:$0xff]  ;;  %s364_s3 = smov [#allocation6]  }
  0x18   :  { %296 = vmatprep.mubr.msk.f32.mxu1 %vm363_vm2, %v362_v10  ;;  %295 = vmatpush3.msk.msra.mxu1 %vm182_vm5, %v170_v25  ;;  %vm178_vm6 = vcmask 15360   ;;  %v281_v31 = vld [vmem:[%s443_s4] ss:$0 sm:$0xff]  ;;  %s269_s2 = sshll.u32 %s364_s3, 4  ;;  %s270_s2 = int_to_ptr.vmem [resolvable:$true] %s269_s2 }
  0x19   :  { %54 = vadd.xlane.f32.xlu0 %v53_v8  ;;  %s333_s13 = scalar_lea.vmem %s270_s2, 32  ;;  %p338_p9 = scmp.lt.s32.totalorder %s270_s2, %s270_s2 }
  0x1a   :  { %p334_p8 = scmp.ne.s32.totalorder %s270_s2, %s333_s13  ;;  %p339_p10 = scmp.lt.s32.totalorder %s333_s13, %s333_s13 }
  0x1c   :  { %p340_p11 = por %p339_p10, %p338_p9 }
  0x1d   :  { %59 = vadd.xlane.f32.xlu0 %v58_v9  ;;  %v43_v20 = vld [vmem:[#allocation2] sm:$0x3] }
  0x1e   :  { %p341_p12 = pnand %p340_p11, %p334_p8 }
  0xa6   :  { %v55_v15 = vpop.xlane.xlu0 %54 }
  0xa7   :  { %v68_v18 = vrot.slane %v55_v15, %v67_v16 }
  0xaa   :  { %v60_v17 = vpop.xlane.xlu0 %59 }
  0xab   :  { %v72_v19 = vrot.slane %v60_v17, %v67_v16 }
  0xad   :  { %v74_v21 = vsel %vm73_vm3, %v72_v19, %v68_v18 }
  0xae   :  { %v76_v22 = vadd.f32 %v74_v21, %v43_v20 }
  0xb0   :  { %78 = vst.msk [vmem:[#allocation2] sm:$0x3] %vm39_vm1, %v76_v22 }
  0xb7   :  { %v82_v23 = vld [vmem:[#allocation2] sm:$0x3] }
  0xb8   :  { %v83_v24 = vmul.f32 0.00390625, %v82_v23 }
  0xba   :  { %292 = vmatmul.mubr.msk.f32.vlgmr.msra.gmra.mrb[0].mxu0 %vm92_vm4, %v83_v24 }
 0x18d   :  { %v165_v27 = vpop.f32.mrb[0].mxu0 }
 0x18e   :  { %v166_v28 = vadd.f32 %v278_v26, %v165_v27  ;;  %v293_v29 = vpop.f32.mrb[1].mxu0 }
 0x190   :  { %v169_v30 = vmax.f32 %v166_v28, 0.0 }
 0x192   :  { %297 = vmatmul.mubr.msk.f32.vlgmr.msra.gmra.mrb[0].mxu1 %vm178_vm6, %v169_v30 }
 0x265   :  { %v252_v32 = vpop.f32.mrb[0].mxu1 }
 0x266   :  { %v253_v33 = vadd.f32 %v281_v31, %v252_v32  ;;  %v298_v34 = vpop.f32.mrb[1].mxu1 }
 0x268   :  { %v284_v35 = vmul.f32 -1.442695, %v253_v33 }
 0x26a   :  { %307 = vpow2.f32 %v284_v35 }
 0x274   :  { %v308_v36 = vpop.eup %307 }
 0x275   :  { %v259_v37 = vadd.f32 1.0, %v308_v36 }
 0x277   :  { %309 = vrcp.f32 %v259_v37 }
 0x281   :  { %v310_v38 = vpop.eup %309 }
 0x282   :  { %262 = vst.msk [vmem:[#allocation6] sm:$0x3] %vm39_vm1, %v310_v38 }
 0x283   :  { %344 = shalt.err (!%p341_p12)
}
 0x284   :  { %s345_s15 = scalar_lea.hbm %s444_s5, 32 }
 0x285   :  { %p346_p13 = scmp.ne.s32.totalorder %s444_s5, %s345_s15  ;;  %p349_p0 = scmp.lt.u32.totalorder %s345_s15, %s444_s5 }
 0x287   :  { %p351_p1 = pnand %p349_p0, %p346_p13 }
 0x289   :  { %354 = shalt.err (!%p351_p1)
}
 0x28a   :  { %272 = dma.vmem_to_hbm [thread:$0]  %s270_s2, 32, %s444_s5, [#allocation5]  }
 0x28b   :  { %357 = dma.done.wait [#allocation5], 32  }
 0x28c   :  { %358 = vsyncadd [#allocation5], 4294967264 }
 0x28d   :  { %276 = vsyncpa [#allocation4], 1 }
 0x28e   :  { %277 = vsyncpa [#allocation5], 1 }

</bundles_post_ra>
